<compile_context>
chip_gen: v5e
topology: v5e:2x2
jax: 0.10.0
libtpu: 0.0.40
codegen_flags: <defaults>
</compile_context>

<pallas_src>
import jax
import jax.numpy as jnp
from jax.experimental import pallas as pl
from jax.experimental.pallas import tpu as pltpu

_MAX_DMAS = 4                       # max concurrent DMA chunks
_MIN_CHUNK_BYTES = 4 * 1024 * 1024  # don't split below ~4 MiB per chunk


def _chunk_starts_sizes(lead, n_chunks):
    """Split `lead` rows into n_chunks contiguous (start, size) pieces."""
    base, rem = divmod(lead, n_chunks)
    sizes = [base + (1 if i < rem else 0) for i in range(n_chunks)]
    starts, acc = [], 0
    for s in sizes:
        starts.append(acc)
        acc += s
    return list(zip(starts, sizes))


def _make_copy_kernel(chunks):
    """Build an HBM->HBM DMA copy kernel.

    `chunks` is either None (single whole-array DMA) or a static list of
    (start, size) Python ints along the leading axis.
    """

    def kernel(x_hbm, o_hbm, sems):
        copies = []
        if chunks is None:
            copies.append(pltpu.make_async_copy(x_hbm, o_hbm, sems.at[0]))
        else:
            for ci, (start, size) in enumerate(chunks):
                copies.append(
                    pltpu.make_async_copy(
                        x_hbm.at[pl.ds(start, size)],
                        o_hbm.at[pl.ds(start, size)],
                        sems.at[ci],
                    )
                )
        # Start all DMAs first so they are in flight concurrently, then wait.
        for cp in copies:
            cp.start()
        for cp in copies:
            cp.wait()

    return kernel


@jax.jit
def identity_pallas(x):
    """Identity forward pass (== _Identity.forward): returns an array equal to x."""
    if x.size == 0:
        return x  # nothing to copy

    nbytes = x.size * x.dtype.itemsize

    # Chunk the leading axis into up to 4 in-flight DMAs when the array is
    # large enough that each chunk stays >= _MIN_CHUNK_BYTES.
    chunks = None
    n_sems = 1
    if x.ndim >= 1 and x.shape[0] >= 2 and nbytes >= 2 * _MIN_CHUNK_BYTES:
        n_chunks = int(min(_MAX_DMAS, x.shape[0], nbytes // _MIN_CHUNK_BYTES))
        if n_chunks >= 2:
            chunks = _chunk_starts_sizes(x.shape[0], n_chunks)
            n_sems = n_chunks

    return pl.pallas_call(
        _make_copy_kernel(chunks),
        out_shape=jax.ShapeDtypeStruct(x.shape, x.dtype),
        in_specs=[pl.BlockSpec(memory_space=pl.ANY)],   # raw HBM ref, no auto-DMA
        out_specs=pl.BlockSpec(memory_space=pl.ANY),    # raw HBM ref, no auto-DMA
        scratch_shapes=[pltpu.SemaphoreType.DMA((n_sems,))],
        cost_estimate=pl.CostEstimate(
            flops=0, transcendentals=0, bytes_accessed=2 * nbytes
        ),
    )(x)


if __name__ == "__main__":
    k0, k1, k2, k3 = jax.random.split(jax.random.PRNGKey(0), 4)

    # 1) Small "penultimate layer features" style input, NCHW (as in the spec).
    x = jax.random.normal(k0, (2, 4, 16, 16), dtype=jnp.float32)
    y = identity_pallas(x)
    jax.block_until_ready(y)
    assert y.shape == x.shape and y.dtype == x.dtype, (y.shape, y.dtype)
    assert bool(jnp.array_equal(y, x)), "identity mismatch (small f32)"

    # 2) Larger input (8 MiB): exercises the multi-DMA chunked path.
    x2 = jax.random.normal(k1, (8, 256, 32, 32), dtype=jnp.float32)
    y2 = identity_pallas(x2)
    jax.block_until_ready(y2)
    assert bool(jnp.array_equal(y2, x2)), "identity mismatch (large f32)"

    # 3) Ragged size (not a multiple of 128): whole-array DMA, no pad/slice.
    x3 = jax.random.normal(k2, (3, 5, 7), dtype=jnp.float32)
    y3 = identity_pallas(x3)
    jax.block_until_ready(y3)
    assert bool(jnp.array_equal(y3, x3)), "identity mismatch (ragged)"

    # 4) bf16: DMA copy is dtype-agnostic.
    x4 = jax.random.normal(k3, (2, 4, 16, 16), dtype=jnp.bfloat16)
    y4 = identity_pallas(x4)
    jax.block_until_ready(y4)
    assert y4.dtype == x4.dtype and bool(jnp.array_equal(y4, x4)), "identity mismatch (bf16)"

    print("KERNEL_OK")
</pallas_src>

<mosaic_0001>
module attributes {stable_mosaic.version = 11 : i64} {
  func.func @kernel(%arg0: memref<2x4x16x16xf32, #tpu.memory_space<any>>, %arg1: memref<2x4x16x16xf32, #tpu.memory_space<any>>, %arg2: memref<1x!tpu.dma_semaphore, #tpu.memory_space<semaphore_mem>>) attributes {dimension_semantics = [], scalar_prefetch = 0 : i64, scratch_operands = 1 : i64, tpu.core_type = #tpu.core_type<tc>} {
    %c0_i32 = arith.constant 0 : i32
    %0 = tpu.memref_slice %arg2[%c0_i32] : memref<1x!tpu.dma_semaphore, #tpu.memory_space<semaphore_mem>> -> memref<1x!tpu.dma_semaphore, #tpu.memory_space<semaphore_mem>>
    %1 = tpu.memref_squeeze %0 : memref<1x!tpu.dma_semaphore, #tpu.memory_space<semaphore_mem>> -> memref<!tpu.dma_semaphore, #tpu.memory_space<semaphore_mem>>
    tpu.enqueue_dma source(%arg0 : memref<2x4x16x16xf32, #tpu.memory_space<any>>) target(%arg1 : memref<2x4x16x16xf32, #tpu.memory_space<any>>) target_semaphore(%1 : memref<!tpu.dma_semaphore, #tpu.memory_space<semaphore_mem>>)
    %c0_i32_0 = arith.constant 0 : i32
    %2 = tpu.memref_slice %arg2[%c0_i32_0] : memref<1x!tpu.dma_semaphore, #tpu.memory_space<semaphore_mem>> -> memref<1x!tpu.dma_semaphore, #tpu.memory_space<semaphore_mem>>
    %3 = tpu.memref_squeeze %2 : memref<1x!tpu.dma_semaphore, #tpu.memory_space<semaphore_mem>> -> memref<!tpu.dma_semaphore, #tpu.memory_space<semaphore_mem>>
    tpu.wait_dma2 semaphore(%3 : memref<!tpu.dma_semaphore, #tpu.memory_space<semaphore_mem>>) src(%arg0 : memref<2x4x16x16xf32, #tpu.memory_space<any>>) dst(%arg1 : memref<2x4x16x16xf32, #tpu.memory_space<any>>)
    return
  }
}

</mosaic_0001>

<bundles_post_ra>
// kernel: identity_pallas.1
= control target key start
LH: loop header
LB: loop body
LE: loop exit
PB: predicated region body
PF: predicated region fallthrough
CT: control target
= control target key end

     0   :  { %s34_s12 = smov [#allocation2]   ;;  %s35_s13 = smov [#allocation3]   ;;  %s53_s0 = inlined_call_operand.hbm [shape: f32[2,4,16,16], index: 0, kind: input, shape index: {}]   ;;  %s54_s1 = inlined_call_operand.hbm [shape: f32[2,4,16,16], index: 1, kind: output, shape index: {}]  }
   0x1   :  { %s10_s8 = sshll.u32 %s53_s0, 4  ;;  %s12_s11 = sshll.u32 %s54_s1, 4  ;;  %s11_s8 = int_to_ptr.hbm [resolvable:$true] %s10_s8  ;;  %s13_s11 = int_to_ptr.hbm [resolvable:$true] %s12_s11 }
   0x2   :  { %s36_s14 = smov 0  }
   0x3   :  { %16 = dma.general %s11_s8, 2048, %s13_s11, %s34_s12, %s35_s13, [#allocation4], %s36_s14, 0  }
   0x4   :  { %32 = dma.done.wait [#allocation2], 2048 }
   0x5   :  { %33 = vsyncadd [#allocation2], 4294965248 }
   0x6   :  { %22 = vsyncmov [#allocation2] }
   0x9   :  { %s23_s15 = vpop.sfrf %22 }
   0xa   :  { %p28_p0 = scmp.ne.s32.totalorder %s23_s15, 0 }
   0xc   :  { %27 = shalt.err (%p28_p0)  }

</bundles_post_ra>
